<compile_context>
chip_gen: v6e
topology: v6e:2x2x1
jax: 0.10.0
libtpu: 0.0.40
codegen_flags: <defaults>
</compile_context>

<pallas_src>
import jax
import jax.numpy as jnp
from jax import lax
from jax.experimental import pallas as pl
from jax.experimental.pallas import tpu as pltpu


def _make_lasso_kernel(D, tk):
    ragged_k = (D % tk) != 0

    def kernel(w_ref, off_ref, x_ref, o_ref):
        # w_ref:   (1, tk)  VMEM  f32 weight slice (resident when tk == D)
        # off_ref: (1,)     SMEM  bias + intercept folded into one scalar
        # x_ref:   (tb, tk) VMEM  streamed batch tile
        # o_ref:   (1, tb)  VMEM  f32 output tile, doubles as the K accumulator
        k = pl.program_id(1)

        @pl.when(k == 0)
        def _init():
            o_ref[...] = jnp.zeros_like(o_ref)

        w = w_ref[...].astype(jnp.float32)
        x = x_ref[...]
        if ragged_k:
            # Zero out-of-bounds columns of the last (ragged) K block so stale
            # VMEM garbage cannot pollute the accumulation.
            col = lax.broadcasted_iota(jnp.int32, (1, tk), 1) + k * tk
            valid = col < D
            w = jnp.where(valid, w, 0.0)
            x = jnp.where(valid, x, 0)

        # (1, tk) x (tb, tk) -> (1, tb): contract over the feature dim so the
        # batch lands on the lane axis. f32 accumulation (weight kept in f32).
        y = lax.dot_general(
            w, x.astype(jnp.float32),
            dimension_numbers=(((1,), (1,)), ((), ())),
            preferred_element_type=jnp.float32,
        )
        o_ref[...] += y

        @pl.when(k == pl.num_programs(1) - 1)
        def _finalize():
            o_ref[...] += off_ref[0]

    return kernel


def lasso_forward(x, weight, bias, intercept):
    """x: (B, D); weight: (1, D) torch-Linear layout; bias, intercept: (1,)."""
    B, D = x.shape
    w = weight.reshape(1, D).astype(jnp.float32)        # keep weight in f32
    offset = (bias.astype(jnp.float32)
              + intercept.astype(jnp.float32)).reshape(1)

    itemsize = jnp.dtype(x.dtype).itemsize

    # Generation-aware budgets: x-tile size + explicit scoped-VMEM limit.
    try:
        vmem_cap = int(pltpu.get_tpu_info().vmem_capacity_bytes)
    except Exception:
        vmem_cap = 64 * 1024 * 1024                     # assume v7x (smallest)
    if vmem_cap >= 96 * 1024 * 1024:                    # v5e / v6e: 128 MiB
        tile_budget = 20 * 1024 * 1024
        vmem_limit = 64 * 1024 * 1024
    else:                                               # v7x: 64 MiB per TC
        tile_budget = 14 * 1024 * 1024
        vmem_limit = 44 * 1024 * 1024

    # Tile sizing: largest double-bufferable x tile (per-grid-step overhead
    # ~0.35 us dominates small tiles). If even a single 128-row tile of the
    # full feature dim would blow the budget, tile the feature (K) dim too.
    row_bytes = D * itemsize
    if 128 * row_bytes <= tile_budget:
        tk = D
        tb = max(128, (tile_budget // row_bytes) // 128 * 128)
    else:
        tb = 128
        tk = max(128, (tile_budget // (128 * itemsize)) // 128 * 128)

    tb = min(tb, B)                                     # small B: one full block
    if B > 256 and pl.cdiv(B, tb) < 2:
        # Give both v7x TensorCores work on the "parallel" batch axis.
        tb = max(128, pl.cdiv(pl.cdiv(B, 2), 128) * 128)

    n_b = pl.cdiv(B, tb)
    n_k = pl.cdiv(D, tk)

    out = pl.pallas_call(
        _make_lasso_kernel(D, tk),
        out_shape=jax.ShapeDtypeStruct((1, B), jnp.float32),
        grid=(n_b, n_k),
        in_specs=[
            pl.BlockSpec((1, tk), lambda i, k: (0, k)),            # weight
            pl.BlockSpec(memory_space=pltpu.MemorySpace.SMEM),     # folded scalar
            pl.BlockSpec((tb, tk), lambda i, k: (i, k)),           # streamed x
        ],
        out_specs=pl.BlockSpec((1, tb), lambda i, k: (0, i)),      # lane-dense out
        compiler_params=pltpu.CompilerParams(
            dimension_semantics=("parallel", "arbitrary"),
            vmem_limit_bytes=vmem_limit,
        ),
        cost_estimate=pl.CostEstimate(
            flops=2 * B * D,
            transcendentals=0,
            bytes_accessed=B * D * itemsize + D * 4 + B * 4,
        ),
    )(w, offset, x)

    # torch: linear(x).squeeze() + intercept -> (B,) for B > 1, (1,) for B == 1.
    return out[0]


def init_params(input_dim, key):
    # Mimic torch.nn.Linear default init (uniform +/- 1/sqrt(in_features)),
    # then apply_constraint(): clamp weight to min=0. Intercept starts at 0.
    kw, kb = jax.random.split(key)
    bound = 1.0 / jnp.sqrt(jnp.float32(input_dim))
    weight = jax.random.uniform(kw, (1, input_dim), jnp.float32, -bound, bound)
    weight = jnp.clip(weight, 0.0, None)        # apply_constraint (at init time)
    bias = jax.random.uniform(kb, (1,), jnp.float32, -bound, bound)
    intercept = jnp.zeros((1,), jnp.float32)
    return weight, bias, intercept


if __name__ == "__main__":
    key = jax.random.PRNGKey(0)
    k_x, k_p = jax.random.split(key)
    batch, input_dim = 8, 32
    x = jax.random.normal(k_x, (batch, input_dim), jnp.float32)
    weight, bias, intercept = init_params(input_dim, k_p)

    y = lasso_forward(x, weight, bias, intercept)
    jax.block_until_ready(y)

    # Reference check in plain JAX (matches the PyTorch forward).
    y_ref = (x @ weight.T).reshape(-1) + bias[0] + intercept[0]
    assert y.shape == (batch,), y.shape
    assert jnp.allclose(y, y_ref, atol=1e-5, rtol=1e-5), (y, y_ref)
    print("KERNEL_OK")
</pallas_src>

<mosaic_0001>
module attributes {stable_mosaic.version = 11 : i64} {
  func.func @kernel(%arg0: i32, %arg1: i32, %arg2: memref<1x32xf32, #tpu.memory_space<vmem>>, %arg3: memref<1xf32, #tpu.memory_space<smem>>, %arg4: memref<8x32xf32, #tpu.memory_space<vmem>>, %arg5: memref<1x8xf32, #tpu.memory_space<vmem>>) attributes {dimension_semantics = [#tpu.dimension_semantics<parallel>, #tpu.dimension_semantics<arbitrary>], iteration_bounds = array<i64: 1, 1>, scalar_prefetch = 0 : i64, scratch_operands = 0 : i64, tpu.core_type = #tpu.core_type<tc>, window_params = [{transform_indices = @transform_0, window_bounds = array<i64: 1, 32>}, {transform_indices = @transform_1, window_bounds = array<i64: 1>}, {transform_indices = @transform_2, window_bounds = array<i64: 8, 32>}, {transform_indices = @transform_3, window_bounds = array<i64: 1, 8>}]} {
    %c0_i32 = arith.constant 0 : i32
    %0 = arith.cmpi eq, %arg1, %c0_i32 : i32
    %1 = arith.extui %0 : i1 to i32
    %c0_i32_0 = arith.constant 0 : i32
    %2 = arith.cmpi ne, %1, %c0_i32_0 : i32
    scf.if %2 {
      %cst_10 = arith.constant 0.000000e+00 : f32
      %12 = vector.broadcast %cst_10 : f32 to vector<1x8xf32>
      %c0_11 = arith.constant 0 : index
      %c0_12 = arith.constant 0 : index
      %13 = vector.load %arg5[%c0_11, %c0_12] : memref<1x8xf32, #tpu.memory_space<vmem>>, vector<1x8xf32>
      tpu.vector_store %arg5[%c0_11, %c0_12], %12 {strides = array<i32>} : memref<1x8xf32, #tpu.memory_space<vmem>>, vector<1x8xf32>,
    } else {
    }
    %c0 = arith.constant 0 : index
    %c0_1 = arith.constant 0 : index
    %3 = vector.load %arg2[%c0, %c0_1] : memref<1x32xf32, #tpu.memory_space<vmem>>, vector<1x32xf32>
    %c0_2 = arith.constant 0 : index
    %c0_3 = arith.constant 0 : index
    %4 = vector.load %arg4[%c0_2, %c0_3] : memref<8x32xf32, #tpu.memory_space<vmem>>, vector<8x32xf32>
    %cst = arith.constant dense<0.000000e+00> : vector<1x8xf32>
    %5 = tpu.matmul %3, %4, %cst {dimension_numbers = #tpu.dot_dimension_numbers<[1], [1], [0], [0], [0, 0, 1, 0], [], []>} : vector<1x32xf32>, vector<8x32xf32>, vector<1x8xf32> -> vector<1x8xf32>
    %c0_4 = arith.constant 0 : index
    %c0_5 = arith.constant 0 : index
    %6 = vector.load %arg5[%c0_4, %c0_5] : memref<1x8xf32, #tpu.memory_space<vmem>>, vector<1x8xf32>
    %7 = arith.addf %6, %5 : vector<1x8xf32>
    %c0_6 = arith.constant 0 : index
    %c0_7 = arith.constant 0 : index
    %8 = vector.load %arg5[%c0_6, %c0_7] : memref<1x8xf32, #tpu.memory_space<vmem>>, vector<1x8xf32>
    tpu.vector_store %arg5[%c0_6, %c0_7], %7 {strides = array<i32>} : memref<1x8xf32, #tpu.memory_space<vmem>>, vector<1x8xf32>,
    %c0_i32_8 = arith.constant 0 : i32
    %9 = arith.cmpi eq, %arg1, %c0_i32_8 : i32
    %10 = arith.extui %9 : i1 to i32
    %c0_i32_9 = arith.constant 0 : i32
    %11 = arith.cmpi ne, %10, %c0_i32_9 : i32
    scf.if %11 {
      %c0_10 = arith.constant 0 : index
      %c0_11 = arith.constant 0 : index
      %12 = vector.load %arg5[%c0_10, %c0_11] : memref<1x8xf32, #tpu.memory_space<vmem>>, vector<1x8xf32>
      %c0_12 = arith.constant 0 : index
      %13 = memref.load %arg3[%c0_12] : memref<1xf32, #tpu.memory_space<smem>>
      %14 = vector.broadcast %13 : f32 to vector<1x8xf32>
      %15 = arith.addf %12, %14 : vector<1x8xf32>
      %c0_13 = arith.constant 0 : index
      %c0_14 = arith.constant 0 : index
      %16 = vector.load %arg5[%c0_13, %c0_14] : memref<1x8xf32, #tpu.memory_space<vmem>>, vector<1x8xf32>
      tpu.vector_store %arg5[%c0_13, %c0_14], %15 {strides = array<i32>} : memref<1x8xf32, #tpu.memory_space<vmem>>, vector<1x8xf32>,
    } else {
    }
    return
  }
  func.func @transform_0(%arg0: i32, %arg1: i32) -> (i32, i32) {
    %c0_i32 = arith.constant 0 : i32
    %c0_i32_0 = arith.constant 0 : i32
    return %c0_i32, %arg1 : i32, i32
  }
  func.func @transform_1(%arg0: i32, %arg1: i32) -> i32 {
    %c0_i32 = arith.constant 0 : i32
    %c0_i32_0 = arith.constant 0 : i32
    return %c0_i32 : i32
  }
  func.func @transform_2(%arg0: i32, %arg1: i32) -> (i32, i32) {
    %c0_i32 = arith.constant 0 : i32
    return %arg0, %arg1 : i32, i32
  }
  func.func @transform_3(%arg0: i32, %arg1: i32) -> (i32, i32) {
    %c0_i32 = arith.constant 0 : i32
    %c0_i32_0 = arith.constant 0 : i32
    return %c0_i32, %arg0 : i32, i32
  }
}

</mosaic_0001>

<bundles_post_ra>
// kernel: tpu_custom_call.1
= control target key start
LH: loop header
LB: loop body
LE: loop exit
PB: predicated region body
PF: predicated region fallthrough
CT: control target
= control target key end

     0   :  { %9 = vsyncpa [#allocation4], 0  ;;  %s236_s0 = inlined_call_operand.vmem [shape: f32[1,32], index: 0, kind: input, shape index: {}]   ;;  %s237_s1 = inlined_call_operand.<no memory space> [shape: f32[1], index: 1, kind: input, shape index: {}]   ;;  %s238_s2 = inlined_call_operand.hbm [shape: f32[8,32], index: 2, kind: input, shape index: {}]   ;;  %s239_s3 = inlined_call_operand.hbm [shape: f32[1,8], index: 3, kind: output, shape index: {}]  }
   0x1   :  { %10 = vsyncpa [#allocation5], 0  ;;  %s197_s12 = smov [#allocation3]  }
   0x2   :  { %s21_s13 = sshll.u32 %s197_s12, 4  ;;  %s22_s13 = int_to_ptr.vmem [resolvable:$true] %s21_s13 }
   0x3   :  { %s161_s14 = scalar_lea.vmem %s22_s13, 128  ;;  %p166_p1 = scmp.lt.s32.totalorder %s22_s13, %s22_s13 }
   0x4   :  { %p162_p0 = scmp.ne.s32.totalorder %s22_s13, %s161_s14  ;;  %p167_p2 = scmp.lt.s32.totalorder %s161_s14, %s161_s14 }
   0x6   :  { %p168_p3 = por %p167_p2, %p166_p1 }
   0x8   :  { %p169_p4 = pnand %p168_p3, %p162_p0 }
   0xa   :  { %172 = shalt.err (!%p169_p4)
}
   0xb   :  { %24 = dma.hbm_to_vmem [thread:$0]  %s238_s2, 128, %s22_s13, [#allocation4]  }
   0xc   :  { %193 = dma.done.wait [#allocation4], 128  }
   0xd   :  { %194 = vsyncadd [#allocation4], 4294967168  ;;  %vm32_vm0 = vcmask 57344   ;;  %v198_v0 = vmov 0.0   ;;  %vm199_vm1 = vmmov 0   ;;  %vm36_vm2 = vcmask 261120  }
   0xe   :  { %33 = vst.msk [vmem:[#allocation6] sm:$0x1] %vm32_vm0, %v198_v0  ;;  %144 = vmatprep.subr.mxu0 %v198_v0  ;;  %146 = vmatprep.mubr.msk.f32.mxu0 %vm199_vm1, %v198_v0  ;;  %v35_v1 = vld [vmem:[#allocation3] sm:$0xff]  ;;  %v122_v7 = vstv %s237_s1  ;;  %s200_s20 = smov [#allocation6]  }
   0xf   :  { %145 = vmatpush3.xpose.msk.msra.mxu0 %vm36_vm2, %v35_v1  ;;  %v34_v2 = vld [vmem:[%s236_s0] sm:$0x1]  ;;  %s131_s21 = sshll.u32 %s200_s20, 4  ;;  %s132_s21 = int_to_ptr.vmem [resolvable:$true] %s131_s21 }
  0x10   :  { %s173_s22 = scalar_lea.vmem %s132_s21, 16  ;;  %s177_s0 = scalar_lea.vmem %s132_s21, 32 }
  0x11   :  { %p174_p5 = scmp.ne.s32.totalorder %s132_s21, %s173_s22  ;;  %p178_p6 = scmp.lt.s32.totalorder %s132_s21, %s132_s21 }
  0x12   :  { %147 = vmatmul.mubr.msk.f32.vlgmr.msra.gmra.mxu0 %vm36_vm2, %v34_v2  ;;  %p179_p7 = scmp.lt.s32.totalorder %s177_s0, %s173_s22 }
  0x14   :  { %p180_p8 = por %p179_p7, %p178_p6 }
  0x15   :  { %v113_v3 = vld [vmem:[#allocation6] sm:$0x1] }
  0x16   :  { %p181_p9 = pnand %p180_p8, %p174_p5 }
  0xd2   :  { %v109_v4 = vpop.f32.mrf.mxu0 }
  0xd3   :  { %v114_v5 = vadd.f32 %v113_v3, %v109_v4 }
  0xd4   :  { %v148_v6 = vpop.f32.mrf.mxu0 }
  0xd5   :  { %116 = vst.msk [vmem:[#allocation6] sm:$0x1] %vm32_vm0, %v114_v5 }
  0xdc   :  { %v120_v8 = vld [vmem:[#allocation6] sm:$0x1] }
  0xdd   :  { %v123_v9 = vadd.f32 %v122_v7, %v120_v8 }
  0xdf   :  { %124 = vst.msk [vmem:[#allocation6] sm:$0x1] %vm32_vm0, %v123_v9 }
  0xe0   :  { %184 = shalt.err (!%p181_p9)
}
  0xe1   :  { %134 = dma.vmem_to_hbm [thread:$0]  %s132_s21, 16, %s239_s3, [#allocation5]  }
  0xe2   :  { %195 = dma.done.wait [#allocation5], 16  }
  0xe3   :  { %196 = vsyncadd [#allocation5], 4294967280 }
  0xe4   :  { %138 = vsyncpa [#allocation4], 1 }
  0xe5   :  { %139 = vsyncpa [#allocation5], 1 }

</bundles_post_ra>
